<compile_context>
chip_gen: v6e
topology: v6e:2x2x1
jax: 0.10.0
libtpu: 0.0.40
codegen_flags: <defaults>
</compile_context>

<pallas_src>
import functools
import math

import jax
import jax.numpy as jnp
from jax.experimental import pallas as pl
from jax.experimental.pallas import tpu as pltpu


LANE = 128
_INV_SQRT2 = 0.7071067811865475


# ----------------------------- in-kernel math ------------------------------

def _gelu_exact(x):
    # Matches torch.nn.functional.gelu default (erf form), computed in f32.
    # TODO(synk): switch to tanh-approx GELU (EUP slot) if erf parity is not
    #             required and the epilogue ever binds.
    return 0.5 * x * (1.0 + jax.lax.erf(x * _INV_SQRT2))


def _block_tt_kernel(p_ref, w1_ref, b1_ref, w2_ref, b2_ref, o_ref, *, last):
    # p_ref : (K, tm)      im2col patches, M on the lane axis (bf16)
    # w1_ref: (Hdim, K)    conv1 weight with BN1 scale folded in (bf16)
    # b1_ref: (Hdim, 1)    folded BN1 bias (f32)
    # w2_ref: (Cout, Hdim) conv2 (1x1) weight with BN2 scale folded in (f32)
    # b2_ref: (Cout, 1)    folded BN2 bias (f32)
    # o_ref : (Cout, tm)   lane-dense output (bf16)
    h = jnp.dot(w1_ref[...], p_ref[...], preferred_element_type=jnp.float32)
    h = _gelu_exact(h + b1_ref[...])                       # BN1 bias + GELU (f32)
    # conv2 kept fully in f32 so the 0-threshold below is bit-stable.
    y = jnp.dot(w2_ref[...], h, preferred_element_type=jnp.float32)
    y = y + b2_ref[...]                                    # BN2 bias (f32)
    if last:
        y = jnp.maximum(y, 0.0)                            # ReLU
    else:
        # Binarize01Act forward: hard 0/1 threshold at 0.
        # TODO(synk): exact >=0 vs >0 convention of Binarize01Act unavailable.
        y = (y > 0.0).astype(jnp.float32)
    o_ref[...] = y.astype(o_ref.dtype)


# ----------------------------- tiling policy --------------------------------

def _num_tensorcores_per_chip():
    """2 TensorCores per chip on v7x, 1 on v5e/v6e."""
    try:
        kind = jax.devices()[0].device_kind.lower()
    except Exception:  # pragma: no cover - defensive
        return 1
    return 2 if ("v7" in kind or "tpu7" in kind) else 1


def _choose_tiling(K, Hdim, Cout, M, n_tc, vmem_budget_bytes=8 << 20):
    """Pick the lane tile tm (multiple of 128), step count, and padded M."""
    # bf16 sublane packing: rows pack in groups of 16 -> budget with rounded K.
    Kp = -(-K // 16) * 16
    Cop = -(-Cout // 16) * 16
    # Per-lane bytes: double-buffered bf16 patch tile + double-buffered bf16
    # output tile + f32 intermediate h.  Weights/biases are small constants.
    bytes_per_lane = 2 * (2 * Kp) + 2 * (2 * Cop) + 4 * Hdim
    tm_cap = (vmem_budget_bytes // bytes_per_lane) // LANE * LANE
    tm_cap = max(LANE, min(2048, tm_cap))

    Mp = -(-M // LANE) * LANE
    nblk = Mp // LANE
    steps = max(1, -(-Mp // tm_cap))
    if n_tc >= 2 and nblk >= 2:
        # Dual-TC chip: guarantee an even number (>=2) of parallel steps.
        steps = max(steps, 2)
        if steps % 2:
            steps += 1
    blk_per_step = -(-nblk // steps)
    tm = blk_per_step * LANE
    m_padded = steps * tm
    return tm, steps, m_padded


# ------------------------------- fused call ----------------------------------

def fused_block_call(patches_t, w1, b1, w2, b2, last):
    """Fused Block_TT on a (K, M) bf16 patch matrix -> (Cout, M) bf16."""
    K, M = patches_t.shape
    Hdim = w1.shape[0]
    Cout = w2.shape[0]

    n_tc = _num_tensorcores_per_chip()
    tm, steps, m_padded = _choose_tiling(K, Hdim, Cout, M, n_tc)

    p = patches_t
    if m_padded != M:
        p = jnp.pad(p, ((0, 0), (0, m_padded - M)))

    kernel = functools.partial(_block_tt_kernel, last=last)
    out = pl.pallas_call(
        kernel,
        out_shape=jax.ShapeDtypeStruct((Cout, m_padded), jnp.bfloat16),
        grid=(steps,),
        in_specs=[
            pl.BlockSpec((K, tm), lambda i: (0, i)),
            pl.BlockSpec((Hdim, K), lambda i: (0, 0)),
            pl.BlockSpec((Hdim, 1), lambda i: (0, 0)),
            pl.BlockSpec((Cout, Hdim), lambda i: (0, 0)),
            pl.BlockSpec((Cout, 1), lambda i: (0, 0)),
        ],
        out_specs=pl.BlockSpec((Cout, tm), lambda i: (0, i)),
        compiler_params=pltpu.CompilerParams(
            dimension_semantics=("parallel",)),
    )(p,
      w1.astype(jnp.bfloat16),   # conv1 weight on the MXU in bf16
      b1.astype(jnp.float32),
      w2.astype(jnp.float32),    # conv2 kept in f32 (threshold bit-stability)
      b2.astype(jnp.float32))
    return out[:, :M] if m_padded != M else out


# --------------------------------- glue -------------------------------------

def _im2col_kt(x_nchw_bf16, k, pad, stride):
    """Patch extraction directly into (K, M) = (k*k*C, N*Ho*Wo), bf16.

    Row ordering matches the (cout, kh, kw, cin)->(cout, K) weight reshape:
    K index = di*k*C + dj*C + c.  M index = n*Ho*Wo + i*Wo + j.
    """
    # One cheap transpose of the UN-inflated tensor; slabs below are already
    # (C, N, Ho, Wo) and need no further transpose.
    x = jnp.transpose(x_nchw_bf16, (1, 0, 2, 3))                 # (C, N, H, W)
    if pad:
        x = jnp.pad(x, ((0, 0), (0, 0), (pad, pad), (pad, pad)))
    C, N, Hp, Wp = x.shape
    Ho = (Hp - k) // stride + 1
    Wo = (Wp - k) // stride + 1
    rows = []
    for di in range(k):
        for dj in range(k):
            rows.append(
                x[:, :, di:di + stride * Ho:stride,
                        dj:dj + stride * Wo:stride].reshape(C, N * Ho * Wo))
    pt = jnp.concatenate(rows, axis=0)                           # (K, M)
    return pt, (N, Ho, Wo)


def block_tt_forward(x_nchw, params):
    """Forward of Block_TT (inference-mode BN). Returns bf16 NCHW output.

    TODO(synk): final_mask_noise multiply skipped (attribute is None at init).
    TODO(synk): training-mode batch statistics are not supported (inference BN
                is folded into the weights).
    """
    x = x_nchw.astype(jnp.bfloat16)                              # cast BEFORE im2col
    pt, (N, Ho, Wo) = _im2col_kt(x, params["k"], params["pad"], params["stride"])
    out_cm = fused_block_call(pt, params["w1"], params["b1"],
                              params["w2"], params["b2"], params["last"])
    Cout = out_cm.shape[0]
    # (Cout, N*Ho*Wo) -> (N, Cout, Ho, Wo)  (straight back to NCHW)
    return jnp.transpose(out_cm.reshape(Cout, N, Ho, Wo), (1, 0, 2, 3))


# ------------------------ deterministic parameters ---------------------------

def _make_grouped_conv_weight_t(key, cout, cin, k, groups):
    """Conv weight as a (cout, k*k*cin) matmul matrix (row-major (kh,kw,cin))."""
    cin_g, cout_g = cin // groups, cout // groups
    w = jax.random.normal(key, (cout, cin_g, k, k), jnp.float32) * (
        1.0 / math.sqrt(cin_g * k * k))
    if groups == 1:
        dense = w
    else:
        # TODO(synk): at large group counts, replace the zero-masked dense
        # matrix with per-group block-diagonal matmuls to avoid wasted MXU work.
        dense = jnp.zeros((cout, cin, k, k), jnp.float32)
        for g in range(groups):
            dense = dense.at[g * cout_g:(g + 1) * cout_g,
                             g * cin_g:(g + 1) * cin_g].set(
                w[g * cout_g:(g + 1) * cout_g])
    # (cout, cin, kh, kw) -> (cout, kh, kw, cin) -> (cout, k*k*cin)
    return jnp.transpose(dense, (0, 2, 3, 1)).reshape(cout, k * k * cin)


def _make_bn(key, c, eps=1e-5):
    """Inference-mode BatchNorm folded to per-channel (scale, bias)."""
    kg, kb = jax.random.split(key)
    gamma = 1.0 + 0.1 * jax.random.normal(kg, (c,), jnp.float32)
    beta = 0.1 * jax.random.normal(kb, (c,), jnp.float32)
    running_mean = jnp.zeros((c,), jnp.float32)   # fresh-module running stats
    running_var = jnp.ones((c,), jnp.float32)
    scale = gamma / jnp.sqrt(running_var + eps)
    bias = beta - running_mean * scale
    return scale[:, None], bias[:, None]


def make_block_tt_params(key, in_planes, out_planes, k=3, t=8, padding=1,
                         stride=1, groupsici=1, last=False):
    k1, k2, k3, k4 = jax.random.split(key, 4)
    hid = t * in_planes
    w1 = _make_grouped_conv_weight_t(k1, hid, in_planes, k, groupsici)
    w2 = _make_grouped_conv_weight_t(k3, out_planes, hid, 1, groupsici)
    s1, b1 = _make_bn(k2, hid)
    s2, b2 = _make_bn(k4, out_planes)
    # Fold BN scales into the conv weights (exact for inference-mode BN).
    return dict(k=k, pad=padding, stride=stride, last=last,
                w1=w1 * s1, b1=b1, w2=w2 * s2, b2=b2)


# ---------------------------------- main -------------------------------------

if __name__ == "__main__":
    key = jax.random.PRNGKey(0)
    kx, kp = jax.random.split(key)
    N, C, Hs, Ws = 2, 4, 16, 16
    out_planes = 8
    x = jax.random.normal(kx, (N, C, Hs, Ws), jnp.float32)
    params = make_block_tt_params(kp, C, out_planes, k=3, t=8, padding=1,
                                  stride=1, groupsici=1, last=False)

    fwd = jax.jit(lambda xx: block_tt_forward(xx, params))
    y = jax.block_until_ready(fwd(x))

    assert y.shape == (N, out_planes, Hs, Ws), y.shape
    yf = y.astype(jnp.float32)
    assert bool(jnp.all(jnp.isfinite(yf)))
    # Binarize01Act output must be exactly {0, 1}
    assert bool(jnp.all((yf == 0.0) | (yf == 1.0)))
    print("KERNEL_OK")
</pallas_src>

<mosaic_0001>
module attributes {stable_mosaic.version = 11 : i64} {
  func.func @_block_tt_kernel(%arg0: i32, %arg1: memref<36x512xbf16, #tpu.memory_space<vmem>>, %arg2: memref<32x36xbf16, #tpu.memory_space<vmem>>, %arg3: memref<32x1xf32, #tpu.memory_space<vmem>>, %arg4: memref<8x32xf32, #tpu.memory_space<vmem>>, %arg5: memref<8x1xf32, #tpu.memory_space<vmem>>, %arg6: memref<8x512xbf16, #tpu.memory_space<vmem>>) attributes {dimension_semantics = [#tpu.dimension_semantics<parallel>], iteration_bounds = array<i64: 1>, scalar_prefetch = 0 : i64, scratch_operands = 0 : i64, tpu.core_type = #tpu.core_type<tc>, window_params = [{transform_indices = @transform_0, window_bounds = array<i64: 36, 512>}, {pipeline_mode = #tpu.pipeline_mode<synchronous>, transform_indices = @transform_1, window_bounds = array<i64: 32, 36>}, {pipeline_mode = #tpu.pipeline_mode<synchronous>, transform_indices = @transform_2, window_bounds = array<i64: 32, 1>}, {pipeline_mode = #tpu.pipeline_mode<synchronous>, transform_indices = @transform_3, window_bounds = array<i64: 8, 32>}, {pipeline_mode = #tpu.pipeline_mode<synchronous>, transform_indices = @transform_4, window_bounds = array<i64: 8, 1>}, {transform_indices = @transform_5, window_bounds = array<i64: 8, 512>}]} {
    %c0 = arith.constant 0 : index
    %c0_0 = arith.constant 0 : index
    %0 = vector.load %arg2[%c0, %c0_0] : memref<32x36xbf16, #tpu.memory_space<vmem>>, vector<32x36xbf16>
    %c0_1 = arith.constant 0 : index
    %c0_2 = arith.constant 0 : index
    %1 = vector.load %arg1[%c0_1, %c0_2] : memref<36x512xbf16, #tpu.memory_space<vmem>>, vector<36x512xbf16>
    %cst = arith.constant dense<0.000000e+00> : vector<32x512xf32>
    %2 = tpu.matmul %0, %1, %cst {dimension_numbers = #tpu.dot_dimension_numbers<[1], [0], [0], [1], [0, 0, 1, 1], [], []>} : vector<32x36xbf16>, vector<36x512xbf16>, vector<32x512xf32> -> vector<32x512xf32>
    %c0_3 = arith.constant 0 : index
    %c0_4 = arith.constant 0 : index
    %3 = vector.load %arg3[%c0_3, %c0_4] : memref<32x1xf32, #tpu.memory_space<vmem>>, vector<32x1xf32>
    %4 = vector.broadcast %3 : vector<32x1xf32> to vector<32x512xf32>
    %5 = arith.addf %2, %4 : vector<32x512xf32>
    %cst_5 = arith.constant 5.000000e-01 : f32
    %6 = vector.broadcast %cst_5 : f32 to vector<32x512xf32>
    %7 = arith.mulf %6, %5 : vector<32x512xf32>
    %cst_6 = arith.constant 0.707106769 : f32
    %8 = vector.broadcast %cst_6 : f32 to vector<32x512xf32>
    %9 = arith.mulf %5, %8 : vector<32x512xf32>
    %10 = math.erf %9 : vector<32x512xf32>
    %cst_7 = arith.constant 1.000000e+00 : f32
    %11 = vector.broadcast %cst_7 : f32 to vector<32x512xf32>
    %12 = arith.addf %11, %10 : vector<32x512xf32>
    %13 = arith.mulf %7, %12 : vector<32x512xf32>
    %c0_8 = arith.constant 0 : index
    %c0_9 = arith.constant 0 : index
    %14 = vector.load %arg4[%c0_8, %c0_9] : memref<8x32xf32, #tpu.memory_space<vmem>>, vector<8x32xf32>
    %cst_10 = arith.constant dense<0.000000e+00> : vector<8x512xf32>
    %15 = tpu.matmul %14, %13, %cst_10 {dimension_numbers = #tpu.dot_dimension_numbers<[1], [0], [0], [1], [0, 0, 1, 1], [], []>} : vector<8x32xf32>, vector<32x512xf32>, vector<8x512xf32> -> vector<8x512xf32>
    %c0_11 = arith.constant 0 : index
    %c0_12 = arith.constant 0 : index
    %16 = vector.load %arg5[%c0_11, %c0_12] : memref<8x1xf32, #tpu.memory_space<vmem>>, vector<8x1xf32>
    %17 = vector.broadcast %16 : vector<8x1xf32> to vector<8x512xf32>
    %18 = arith.addf %15, %17 : vector<8x512xf32>
    %cst_13 = arith.constant 0.000000e+00 : f32
    %19 = vector.broadcast %cst_13 : f32 to vector<8x512xf32>
    %20 = arith.cmpf ogt, %18, %19 : vector<8x512xf32>
    %21 = arith.extui %20 : vector<8x512xi1> to vector<8x512xi32>
    %22 = arith.sitofp %21 : vector<8x512xi32> to vector<8x512xf32>
    %23 = arith.truncf %22 : vector<8x512xf32> to vector<8x512xbf16>
    %c0_14 = arith.constant 0 : index
    %c0_15 = arith.constant 0 : index
    %24 = vector.load %arg6[%c0_14, %c0_15] : memref<8x512xbf16, #tpu.memory_space<vmem>>, vector<8x512xbf16>
    tpu.vector_store %arg6[%c0_14, %c0_15], %23 {strides = array<i32>} : memref<8x512xbf16, #tpu.memory_space<vmem>>, vector<8x512xbf16>,
    return
  }
  func.func @transform_0(%arg0: i32) -> (i32, i32) {
    %c0_i32 = arith.constant 0 : i32
    %c0_i32_0 = arith.constant 0 : i32
    return %c0_i32, %arg0 : i32, i32
  }
  func.func @transform_1(%arg0: i32) -> (i32, i32) {
    %c0_i32 = arith.constant 0 : i32
    %c0_i32_0 = arith.constant 0 : i32
    %c0_i32_1 = arith.constant 0 : i32
    return %c0_i32, %c0_i32_0 : i32, i32
  }
  func.func @transform_2(%arg0: i32) -> (i32, i32) {
    %c0_i32 = arith.constant 0 : i32
    %c0_i32_0 = arith.constant 0 : i32
    %c0_i32_1 = arith.constant 0 : i32
    return %c0_i32, %c0_i32_0 : i32, i32
  }
  func.func @transform_3(%arg0: i32) -> (i32, i32) {
    %c0_i32 = arith.constant 0 : i32
    %c0_i32_0 = arith.constant 0 : i32
    %c0_i32_1 = arith.constant 0 : i32
    return %c0_i32, %c0_i32_0 : i32, i32
  }
  func.func @transform_4(%arg0: i32) -> (i32, i32) {
    %c0_i32 = arith.constant 0 : i32
    %c0_i32_0 = arith.constant 0 : i32
    %c0_i32_1 = arith.constant 0 : i32
    return %c0_i32, %c0_i32_0 : i32, i32
  }
  func.func @transform_5(%arg0: i32) -> (i32, i32) {
    %c0_i32 = arith.constant 0 : i32
    %c0_i32_0 = arith.constant 0 : i32
    return %c0_i32, %arg0 : i32, i32
  }
}

</mosaic_0001>

<bundles_post_ra>
// kernel: _lambda_.1
= control target key start
LH: loop header
LB: loop body
LE: loop exit
PB: predicated region body
PF: predicated region fallthrough
CT: control target
= control target key end

     0   :  { %vm126_vm0 = vcmask 1041408   ;;  %v596_v2 = vmov 0   ;;  %vm119_vm1 = vcmask 293888   ;;  %v597_v24 = vmov 0.0   ;;  %s722_s0 = inlined_call_operand.vmem [shape: bf16[36,512], index: 0, kind: input, shape index: {}]   ;;  %s723_s1 = inlined_call_operand.vmem [shape: bf16[32,36], index: 1, kind: input, shape index: {}]   ;;  %s724_s2 = inlined_call_operand.vmem [shape: f32[32,1], index: 2, kind: input, shape index: {}]   ;;  %s725_s4 = inlined_call_operand.vmem [shape: f32[8,1], index: 4, kind: input, shape index: {}]   ;;  %s726_s3 = inlined_call_operand.vmem [shape: f32[8,32], index: 3, kind: input, shape index: {}]   ;;  %s727_s5 = inlined_call_operand.vmem [shape: bf16[8,512], index: 5, kind: output, shape index: {}]  }
   0x1   :  { %v33_v0 = vld [vmem:[%s722_s0 + $0x40] sm:$0x33]  ;;  %v34_v1 = vld [vmem:[%s722_s0 + $0x48] sm:$0x33]  ;;  %171 = vmatprep.mubr.bf16.mxu0 %v596_v2  ;;  %224 = vmatprep.mubr.bf16.mxu1 %v596_v2  ;;  %v38_v18 = vld [vmem:[%s724_s2 + $0x18] sm:$0xff]  ;;  %vm332_vm2 = vcmask 261120  }
   0x2   :  { %v523_v3 = vcombine.high %v33_v0, %v33_v0  ;;  %v525_v4 = vcombine.high %v34_v1, %v34_v1  ;;  %v522_v5 = vcombine.low %v33_v0, %v33_v0  ;;  %v524_v6 = vcombine.low %v34_v1, %v34_v1  ;;  %v550_v7 = vld [vmem:[%s722_s0 + $0x24] ss:$16 sps:$4 sm:$0xff]   ;;  %545 = vset.pattern.permute.xlu1 %v596_v2  ;;  %v552_v8 = vld [vmem:[%s722_s0 + $0x2c] ss:$16 sps:$4 sm:$0xff]   ;;  %v554_v11 = vld [vmem:[%s722_s0 + $0x20] ss:$16 sps:$4 sm:$0xff]  }
   0x3   :  { %544 = vset.pattern.permute.xlu0 %v596_v2  ;;  %v555_v12 = vld [vmem:[%s722_s0 + $0x28] ss:$16 sps:$4 sm:$0xff]   ;;  %v556_v13 = vld [vmem:[%s722_s0 + $0x4] ss:$16 sps:$4 sm:$0xff]   ;;  %v558_v14 = vld [vmem:[%s722_s0 + $0xc] ss:$16 sps:$4 sm:$0xff]  }
   0x4   :  { %526 = vmatprep.subr.msk.bf16.mxu0 %vm126_vm0, %v523_v3  ;;  %529 = vmatprep.subr.msk.bf16.mxu1 %vm126_vm0, %v525_v4  ;;  %v128_v9 = vsel %vm126_vm0, %v522_v5, 0  ;;  %v134_v10 = vsel %vm126_vm0, %v524_v6, 0  ;;  %v560_v15 = vld [vmem:[%s722_s0] ss:$16 sps:$4 sm:$0xff]   ;;  %v561_v16 = vld [vmem:[%s722_s0 + $0x8] ss:$16 sps:$4 sm:$0xff]  }
   0x5   :  { %150 = vmatpush1.bf16.msra.mxu0 %v128_v9  ;;  %203 = vmatpush1.bf16.msra.mxu1 %v134_v10  ;;  %v36_v17 = vld [vmem:[%s724_s2 + $0x8] sm:$0xff]  ;;  %v562_v19 = vld [vmem:[%s723_s1] sm:$0xff]   ;;  %v37_v21 = vld [vmem:[%s724_s2 + $0x10] sm:$0xff] }
   0x6   :  { %151 = vmatprep.subr.bf16.mxu0 %v550_v7  ;;  %204 = vmatprep.subr.bf16.mxu1 %v552_v8  ;;  %v35_v20 = vld [vmem:[%s724_s2] sm:$0xff]  ;;  %v563_v23 = vld [vmem:[%s723_s1 + $0x8] sm:$0xff]  }
   0x7   :  { %46 = vperm.xlu1 %545, %v36_v17   ;;  %56 = vperm.xlu0 %544, %v38_v18   ;;  %v326_v22 = vld [vmem:[%s725_s4] sm:$0xff] }
   0x9   :  { %152 = vmatpush1.bf16.msra.mxu0 %v554_v11  ;;  %205 = vmatpush1.bf16.msra.mxu1 %v555_v12 }
   0xa   :  { %153 = vmatprep.subr.bf16.mxu0 %v556_v13  ;;  %206 = vmatprep.subr.bf16.mxu1 %v558_v14 }
   0xb   :  { %41 = vperm.xlu1 %545, %v35_v20   ;;  %51 = vperm.xlu0 %544, %v37_v21  }
   0xd   :  { %154 = vmatpush1.bf16.msra.mxu0 %v560_v15  ;;  %207 = vmatpush1.bf16.msra.mxu1 %v561_v16 }
   0xf   :  { %329 = vperm.xlu0 %544, %v326_v22  }
  0x10   :  { %527 = vmatmul.mubr.msk.bf16.vlgmr.msra.gmra.mxu0 %vm119_vm1, %v562_v19  ;;  %530 = vmatmul.mubr.msk.bf16.vlgmr.msra.gmra.mxu1 %vm119_vm1, %v562_v19 }
  0x11   :  { %181 = vmatprep.mubr.bf16.mxu0 %v596_v2  ;;  %234 = vmatprep.mubr.bf16.mxu1 %v596_v2 }
  0x18   :  { %528 = vmatmul.mubr.msk.bf16.gmra.mxu0 %vm119_vm1, %v563_v23  ;;  %531 = vmatmul.mubr.msk.bf16.gmra.mxu1 %vm119_vm1, %v563_v23 }
  0x19   :  { %400 = vmatprep.mubr.f32.mxu0 %v597_v24  ;;  %471 = vmatprep.mubr.f32.mxu1 %v597_v24 }
  0x82   :  { %v47_v25 = vpop.permute.xlu1 %46  ;;  %v57_v27 = vpop.permute.xlu0 %56 }
  0x86   :  { %v42_v26 = vpop.permute.xlu1 %41  ;;  %v52_v37 = vpop.permute.xlu0 %51 }
  0xd0   :  { %v173_v28 = vpop.f32.mrf.mxu0  ;;  %v226_v29 = vpop.f32.mrf.mxu1 }
  0xd1   :  { %v685_v30 = vadd.f32 %v173_v28, %v42_v26  ;;  %v698_v5 = vadd.f32 %v226_v29, %v42_v26 }
  0xd2   :  { %v175_v31 = vpop.f32.mrf.mxu0  ;;  %v228_v32 = vpop.f32.mrf.mxu1 }
  0xd3   :  { %v687_v33 = vadd.f32 %v175_v31, %v42_v26  ;;  %v261_v38 = vmul.f32 0.70710677, %v685_v30  ;;  %v694_v0 = vadd.f32 %v228_v32, %v42_v26  ;;  %v263_v12 = vmul.f32 0.70710677, %v698_v5 }
  0xd4   :  { %v177_v34 = vpop.f32.mrf.mxu0  ;;  %v230_v35 = vpop.f32.mrf.mxu1 }
  0xd5   :  { %v689_v36 = vadd.f32 %v177_v34, %v47_v25  ;;  %v262_v41 = vmul.f32 0.70710677, %v687_v33  ;;  %564 = verf.f32 %v261_v38  ;;  %v696_v1 = vadd.f32 %v230_v35, %v47_v25 }
  0xd6   :  { %v179_v39 = vpop.f32.mrf.mxu0  ;;  %v232_v40 = vpop.f32.mrf.mxu1  ;;  %v264_v10 = vmul.f32 0.70710677, %v694_v0  ;;  %v246_v23 = vmul.f32 0.5, %v687_v33 }
  0xd7   :  { %v265_v42 = vmul.f32 0.70710677, %v689_v36  ;;  %v180_v43 = vadd.f32 %v179_v39, %v47_v25  ;;  %v233_v44 = vadd.f32 %v232_v40, %v47_v25  ;;  %566 = verf.f32 %v262_v41 }
  0xd8   :  { %v183_v45 = vpop.f32.mrf.mxu0  ;;  %v236_v46 = vpop.f32.mrf.mxu1  ;;  %v267_v8 = vmul.f32 0.70710677, %v696_v1  ;;  %v249_v25 = vmul.f32 0.5, %v689_v36 }
  0xd9   :  { %v184_v47 = vadd.f32 %v183_v45, %v52_v37  ;;  %v237_v48 = vadd.f32 %v236_v46, %v52_v37  ;;  %v266_v49 = vmul.f32 0.70710677, %v180_v43  ;;  %v268_v52 = vmul.f32 0.70710677, %v233_v44 }
  0xda   :  { %v185_v50 = vpop.f32.mrf.mxu0  ;;  %v238_v51 = vpop.f32.mrf.mxu1  ;;  %568 = verf.f32 %v265_v42  ;;  %v252_v28 = vmul.f32 0.5, %v233_v44 }
  0xdb   :  { %v269_v53 = vmul.f32 0.70710677, %v184_v47  ;;  %v271_v54 = vmul.f32 0.70710677, %v237_v48  ;;  %v186_v55 = vadd.f32 %v185_v50, %v52_v37  ;;  %570 = verf.f32 %v266_v49 }
  0xdc   :  { %v187_v56 = vpop.f32.mrf.mxu0  ;;  %v240_v57 = vpop.f32.mrf.mxu1  ;;  %v239_v58 = vadd.f32 %v238_v51, %v52_v37  ;;  %572 = verf.f32 %v268_v52  ;;  %v253_v29 = vmul.f32 0.5, %v184_v47  ;;  %v255_v31 = vmul.f32 0.5, %v237_v48 }
  0xdd   :  { %v188_v59 = vadd.f32 %v187_v56, %v57_v27  ;;  %v241_v60 = vadd.f32 %v240_v57, %v57_v27  ;;  %v270_v61 = vmul.f32 0.70710677, %v186_v55  ;;  %574 = verf.f32 %v269_v53 }
  0xde   :  { %v189_v62 = vpop.f32.mrf.mxu0  ;;  %v242_v63 = vpop.f32.mrf.mxu1  ;;  %576 = verf.f32 %v271_v54  ;;  %v272_v2 = vmul.f32 0.70710677, %v239_v58  ;;  %v254_v34 = vmul.f32 0.5, %v186_v55  ;;  %v256_v35 = vmul.f32 0.5, %v239_v58 }
  0xdf   :  { %v273_v3 = vmul.f32 0.70710677, %v188_v59  ;;  %v275_v4 = vmul.f32 0.70710677, %v241_v60  ;;  %578 = verf.f32 %v270_v61  ;;  %v190_v6 = vadd.f32 %v189_v62, %v57_v27 }
  0xe0   :  { %v243_v7 = vadd.f32 %v242_v63, %v57_v27  ;;  %v250_v27 = vmul.f32 0.5, %v180_v43  ;;  %v257_v37 = vmul.f32 0.5, %v188_v59  ;;  %v259_v44 = vmul.f32 0.5, %v241_v60 }
  0xe1   :  { %580 = verf.f32 %v273_v3  ;;  %v274_v9 = vmul.f32 0.70710677, %v190_v6  ;;  %v258_v41 = vmul.f32 0.5, %v190_v6  ;;  %v251_v60 = vmul.f32 0.5, %v696_v1 }
  0xe2   :  { %582 = verf.f32 %v275_v4  ;;  %v276_v11 = vmul.f32 0.70710677, %v243_v7  ;;  %v565_v13 = vpop.eup %564  ;;  %v260_v33 = vmul.f32 0.5, %v243_v7 }
  0xe3   :  { %584 = verf.f32 %v272_v2  ;;  %v293_v62 = vadd.f32 1.0, %v565_v13 }
  0xe4   :  { %586 = verf.f32 %v274_v9  ;;  %v567_v14 = vpop.eup %566  ;;  %v248_v9 = vmul.f32 0.5, %v694_v0 }
  0xe5   :  { %588 = verf.f32 %v276_v11  ;;  %v294_v61 = vadd.f32 1.0, %v567_v14 }
  0xe6   :  { %590 = verf.f32 %v267_v8  ;;  %v245_v8 = vmul.f32 0.5, %v685_v30  ;;  %v325_v30 = vld [vmem:[%s726_s3] sm:$0xff] }
  0xe7   :  { %592 = verf.f32 %v264_v10  ;;  %v569_v15 = vpop.eup %568  ;;  %v310_v14 = vmul.f32 %v294_v61, %v246_v23 }
  0xe8   :  { %594 = verf.f32 %v263_v12  ;;  %v571_v16 = vpop.eup %570  ;;  %v297_v53 = vadd.f32 1.0, %v569_v15  ;;  %v247_v12 = vmul.f32 0.5, %v698_v5  ;;  %v309_v15 = vmul.f32 %v293_v62, %v245_v8  ;;  %v330_v5 = vpop.permute.xlu0 %329 }
  0xe9   :  { %v573_v17 = vpop.eup %572  ;;  %v298_v48 = vadd.f32 1.0, %v571_v16 }
  0xea   :  { %v575_v18 = vpop.eup %574  ;;  %v300_v56 = vadd.f32 1.0, %v573_v17  ;;  %v313_v10 = vmul.f32 %v297_v53, %v249_v25 }
  0xeb   :  { %v577_v19 = vpop.eup %576  ;;  %v301_v49 = vadd.f32 1.0, %v575_v18  ;;  %v314_v7 = vmul.f32 %v298_v48, %v250_v27 }
  0xec   :  { %v579_v20 = vpop.eup %578  ;;  %v303_v43 = vadd.f32 1.0, %v577_v19  ;;  %v316_v11 = vmul.f32 %v300_v56, %v252_v28 }
  0xed   :  { %v302_v45 = vadd.f32 1.0, %v579_v20  ;;  %v317_v63 = vmul.f32 %v301_v49, %v253_v29 }
  0xee   :  { %v581_v21 = vpop.eup %580  ;;  %v319_v6 = vmul.f32 %v303_v43, %v255_v31 }
  0xef   :  { %v583_v22 = vpop.eup %582  ;;  %v305_v38 = vadd.f32 1.0, %v581_v21  ;;  %v318_v59 = vmul.f32 %v302_v45, %v254_v34 }
  0xf0   :  { %v585_v26 = vpop.eup %584  ;;  %v307_v40 = vadd.f32 1.0, %v583_v22 }
  0xf1   :  { %v587_v32 = vpop.eup %586  ;;  %v304_v36 = vadd.f32 1.0, %v585_v26  ;;  %v321_v54 = vmul.f32 %v305_v38, %v257_v37 }
  0xf2   :  { %v589_v39 = vpop.eup %588  ;;  %v306_v42 = vadd.f32 1.0, %v587_v32  ;;  %v323_v58 = vmul.f32 %v307_v40, %v259_v44 }
  0xf3   :  { %v591_v46 = vpop.eup %590  ;;  %v308_v50 = vadd.f32 1.0, %v589_v39  ;;  %v320_v2 = vmul.f32 %v304_v36, %v256_v35 }
  0xf4   :  { %v593_v51 = vpop.eup %592  ;;  %v322_v47 = vmul.f32 %v306_v42, %v258_v41  ;;  %v299_v57 = vadd.f32 1.0, %v591_v46 }
  0xf5   :  { %v595_v52 = vpop.eup %594  ;;  %v324_v55 = vmul.f32 %v308_v50, %v260_v33  ;;  %v296_v3 = vadd.f32 1.0, %v593_v51 }
  0xf6   :  { %360 = vmatprep.subr.mxu0 %v322_v47  ;;  %v295_v4 = vadd.f32 1.0, %v595_v52  ;;  %v315_v13 = vmul.f32 %v299_v57, %v251_v60 }
  0xf7   :  { %431 = vmatprep.subr.mxu1 %v324_v55  ;;  %361 = vmatpush1.msra.mxu0 %v321_v54  ;;  %v312_v1 = vmul.f32 %v296_v3, %v248_v9 }
  0xf8   :  { %432 = vmatpush1.msra.mxu1 %v323_v58  ;;  %362 = vmatprep.subr.mxu0 %v318_v59  ;;  %v311_v0 = vmul.f32 %v295_v4, %v247_v12 }
  0xf9   :  { %433 = vmatprep.subr.mxu1 %v320_v2  ;;  %363 = vmatpush1.msra.mxu0 %v317_v63 }
  0xfa   :  { %434 = vmatpush1.msra.mxu1 %v319_v6  ;;  %364 = vmatprep.subr.mxu0 %v314_v7 }
  0xfb   :  { %435 = vmatprep.subr.mxu1 %v316_v11  ;;  %365 = vmatpush1.msra.mxu0 %v313_v10 }
  0xfc   :  { %436 = vmatpush1.msra.mxu1 %v315_v13  ;;  %366 = vmatprep.subr.mxu0 %v310_v14 }
  0xfd   :  { %437 = vmatprep.subr.mxu1 %v312_v1  ;;  %367 = vmatpush1.msra.mxu0 %v309_v15 }
  0xfe   :  { %438 = vmatpush1.msra.mxu1 %v311_v0  ;;  %532 = vmatmul.mubr.msk.f32.vlgmr.msra.gmra.mxu0 %vm332_vm2, %v325_v30 }
  0xff   :  { %533 = vmatmul.mubr.msk.f32.vlgmr.msra.gmra.mxu1 %vm332_vm2, %v325_v30 }
 0x1be   :  { %v402_v16 = vpop.f32.mrf.mxu0 }
 0x1bf   :  { %v403_v17 = vadd.f32 %v402_v16, %v330_v5  ;;  %v473_v18 = vpop.f32.mrf.mxu1 }
 0x1c0   :  { %v474_v19 = vadd.f32 %v473_v18, %v330_v5  ;;  %v404_v20 = vpop.f32.mrf.mxu0 }
 0x1c1   :  { %vm478_vm3 = vcmp.gt.f32.partialorder %v403_v17, 0.0  ;;  %v405_v21 = vadd.f32 %v404_v20, %v330_v5  ;;  %v475_v22 = vpop.f32.mrf.mxu1 }
 0x1c2   :  { %vm480_vm4 = vcmp.gt.f32.partialorder %v474_v19, 0.0  ;;  %v476_v23 = vadd.f32 %v475_v22, %v330_v5  ;;  %v534_v25 = vsel %vm478_vm3, 1.0, %v597_v24 }
 0x1c3   :  { %vm479_vm5 = vcmp.gt.f32.partialorder %v405_v21, 0.0  ;;  %v536_v27 = vsel %vm480_vm4, 1.0, %v597_v24 }
 0x1c4   :  { %v535_v26 = vsel %vm479_vm5, 1.0, %v597_v24  ;;  %vm481_vm6 = vcmp.gt.f32.partialorder %v476_v23, 0.0 }
 0x1c5   :  { %v540_v28 = vpack.c.bf16 %v535_v26, %v534_v25  ;;  %v537_v29 = vsel %vm481_vm6, 1.0, %v597_v24 }
 0x1c6   :  { %v541_v31 = vpack.c.bf16 %v537_v29, %v536_v27 }
 0x1c7   :  { %506 = vst [vmem:[%s727_s5] sm:$0xff] %v540_v28 }
 0x1c8   :  { %507 = vst [vmem:[%s727_s5 + $0x8] sm:$0xff] %v541_v31 }

</bundles_post_ra>
